<compile_context>
chip_gen: v6e
topology: v6e:2x2x1
jax: 0.10.0
libtpu: 0.0.40
codegen_flags: <defaults>
</compile_context>

<pallas_src>
import functools

import jax
import jax.numpy as jnp
from jax.experimental import pallas as pl
from jax.experimental.pallas import tpu as pltpu

_LANES = 128


def _spectral_attention_kernel(
    x_ref,       # [C_eff, hw_tile]   one spatial tile of one batch element
    w1t_ref,     # [hid, C]           first linear, transposed
    b1_ref,      # [hid, 1]
    w2t_ref,     # [out, hid]         second linear, transposed
    b2_ref,      # [out, 1]
    o_ref,       # [out, 1]
    sum_acc,     # VMEM scratch [C_eff, 128] f32 (running lane-wise spatial sum)
    max_acc,     # VMEM scratch [C_eff, 128] f32 (running lane-wise spatial max)
    *,
    hw_total,    # static: true H*W (elements per original channel)
    hw_tile,     # static: spatial tile width (in folded units)
    tail_len,    # static: number of valid columns in the last tile
    needs_mask,  # static: whether the last tile is partial
    fold,        # static: sublane fold factor (1, 2, 4 or 8)
):
    k = pl.program_id(1)
    k_last = pl.num_programs(1) - 1
    c_eff = sum_acc.shape[0]
    c_in = c_eff // fold

    # ---- init accumulators at the first spatial tile of each batch element.
    @pl.when(k == 0)
    def _():
        sum_acc[...] = jnp.zeros(sum_acc.shape, sum_acc.dtype)
        max_acc[...] = jnp.full(max_acc.shape, -jnp.inf, max_acc.dtype)

    # ---- streaming accumulation: lane-wide (no XLU), pure vld + VPU per chunk.
    def accum_full_tile():
        if hw_tile % 512 == 0:
            sub = 512
        elif hw_tile % _LANES == 0:
            sub = _LANES
        else:
            sub = None

        if sub is None:
            # hw_tile equals the full (short) spatial axis: single shot.
            x = x_ref[...].astype(jnp.float32)
            sum_acc[:, 0:1] += jnp.sum(x, axis=-1, keepdims=True)
            max_acc[:, 0:1] = jnp.maximum(
                max_acc[:, 0:1], jnp.max(x, axis=-1, keepdims=True))
            return

        nsup = hw_tile // sub
        nlb = sub // _LANES

        def body(i, carry):
            off = pl.multiple_of(i * sub, sub)
            x = x_ref[:, pl.ds(off, sub)].astype(jnp.float32)     # [C_eff, sub]
            ps = x[:, 0:_LANES]
            pm = ps
            for j in range(1, nlb):
                blk = x[:, j * _LANES:(j + 1) * _LANES]
                ps = ps + blk
                pm = jnp.maximum(pm, blk)
            sum_acc[...] += ps
            max_acc[...] = jnp.maximum(max_acc[...], pm)
            return carry

        jax.lax.fori_loop(0, nsup, body, 0,
                          unroll=True if nsup <= 8 else 2)

    def accum_tail_tile():
        # Only the (statically known) valid 128-lane chunks are touched; the mask
        # is paid only here, once per batch element.
        nvalid = (tail_len + _LANES - 1) // _LANES

        def body(j, carry):
            off = pl.multiple_of(j * _LANES, _LANES)
            x = x_ref[:, pl.ds(off, _LANES)].astype(jnp.float32)  # [C_eff, 128]
            lane = jax.lax.broadcasted_iota(jnp.int32, x.shape, 1)
            valid = (off + lane) < tail_len
            sum_acc[...] += jnp.where(valid, x, 0.0)
            max_acc[...] = jnp.maximum(max_acc[...],
                                       jnp.where(valid, x, -jnp.inf))
            return carry

        jax.lax.fori_loop(0, nvalid, body, 0,
                          unroll=True if nvalid <= 8 else 2)

    if needs_mask:
        @pl.when(k != k_last)
        def _():
            accum_full_tile()

        @pl.when(k == k_last)
        def _():
            accum_tail_tile()
    else:
        accum_full_tile()

    # ---- finalize: single cross-lane reduce, un-fold, fused shared MLP + sigmoid.
    @pl.when(k == k_last)
    def _():
        s_all = jnp.sum(sum_acc[...], axis=-1, keepdims=True)     # [C_eff, 1]
        m_all = jnp.max(max_acc[...], axis=-1, keepdims=True)     # [C_eff, 1]

        if fold > 1:
            s_parts, m_parts = [], []
            for c in range(c_in):
                s_parts.append(jnp.sum(s_all[c * fold:(c + 1) * fold, :],
                                       axis=0, keepdims=True))
                m_parts.append(jnp.max(m_all[c * fold:(c + 1) * fold, :],
                                       axis=0, keepdims=True))
            s_col = jnp.concatenate(s_parts, axis=0)              # [C, 1]
            m_col = jnp.concatenate(m_parts, axis=0)              # [C, 1]
        else:
            s_col, m_col = s_all, m_all

        pooled = jnp.concatenate(
            [s_col * (1.0 / hw_total), m_col], axis=1)            # [C, 2] = [avg|max]

        # SharedMLP: Linear -> ReLU -> Linear -> Sigmoid (both branches at once)
        h = jnp.dot(w1t_ref[...], pooled,
                    preferred_element_type=jnp.float32) + b1_ref[...]   # [hid, 2]
        h = jnp.maximum(h, 0.0)
        o = jnp.dot(w2t_ref[...], h,
                    preferred_element_type=jnp.float32) + b2_ref[...]   # [out, 2]
        o = jax.nn.sigmoid(o)

        y = o[:, 0:1] + o[:, 1:2]                                 # [out, 1]
        o_ref[...] = jax.nn.sigmoid(y)                            # final sigmoid


def _vmem_limit_bytes():
    """Generation-aware scoped VMEM budget (v5e/v6e: 128 MiB phys, v7x: 64 MiB)."""
    cap = None
    try:
        info = pltpu.get_tpu_info()
        cap = getattr(info, "vmem_capacity_bytes", None)
        if not isinstance(cap, (int, float)):
            cap = None
    except Exception:
        cap = None
    if cap is None:
        cap = 64 * 1024 * 1024                    # conservative (v7x-sized) fallback
    if cap >= 100 * 1024 * 1024:                  # v5e / v6e
        return 64 * 1024 * 1024
    return int(min(48 * 1024 * 1024, (cap * 3) // 4))   # v7x


def _pick_hw_tile(hw_eff, c_eff, itemsize, vmem_limit):
    """Spatial tile width: ~4-8 MiB per (double-buffered) tile, multiple of 512."""
    if hw_eff <= 1024:
        return hw_eff                              # single small tile
    c_pad = ((c_eff + 7) // 8) * 8                 # VMEM sublane padding
    bytes_per_col = max(1, c_pad * itemsize)
    target_bytes = min(8 * 1024 * 1024,
                       max(1 * 1024 * 1024, (vmem_limit - 4 * 1024 * 1024) // 3))
    tile = min(hw_eff, target_bytes // bytes_per_col)
    tile = max(512, (tile // 512) * 512)
    return min(tile, hw_eff)


def spectral_attention(x, w1, b1, w2, b2, *, hw_tile=None):
    """x: [B, C, H, W] -> [B, out_features, 1, 1] (matches PyTorch Spectral_attention)."""
    B, C, H, W = x.shape
    hid = w1.shape[1]
    out_f = w2.shape[1]
    HW = H * W

    # ---- sublane fold: pack spatial positions into unused sublanes when C < 8.
    fold = 1
    if C < 8:
        fold = 8 // C
        while fold > 1 and HW % fold != 0:
            fold //= 2
    c_eff = C * fold
    hw_eff = HW // fold
    x_view = x.reshape(B, c_eff, hw_eff)          # free contiguous reinterpretation

    itemsize = jnp.dtype(x.dtype).itemsize
    vmem_limit = _vmem_limit_bytes()
    if hw_tile is None:
        hw_tile = _pick_hw_tile(hw_eff, c_eff, itemsize, vmem_limit)
    assert hw_tile == hw_eff or hw_tile % _LANES == 0, \
        "hw_tile must equal the (folded) spatial axis or be a multiple of 128"

    grid_hw = pl.cdiv(hw_eff, hw_tile)
    needs_mask = (hw_eff % hw_tile) != 0
    tail_len = hw_eff - (grid_hw - 1) * hw_tile

    # Layout plumbing in the wrapper: transposed weights / column biases so the kernel
    # never needs an in-kernel transpose (channels stay on sublanes).
    w1t = jnp.transpose(w1)                        # [hid, C]
    w2t = jnp.transpose(w2)                        # [out, hid]
    b1c = b1.reshape(hid, 1)
    b2c = b2.reshape(out_f, 1)

    kernel = functools.partial(
        _spectral_attention_kernel,
        hw_total=HW, hw_tile=hw_tile, tail_len=tail_len,
        needs_mask=needs_mask, fold=fold)

    cost = pl.CostEstimate(
        flops=int(2 * B * C * HW + 4 * B * (C * hid + hid * out_f)),
        transcendentals=int(3 * B * out_f),
        bytes_accessed=int(B * C * HW * itemsize
                           + (C * hid + hid + hid * out_f + out_f) * 4
                           + B * out_f * 4))

    y = pl.pallas_call(
        kernel,
        out_shape=jax.ShapeDtypeStruct((B, out_f, 1), jnp.float32),
        grid_spec=pltpu.PrefetchScalarGridSpec(
            num_scalar_prefetch=0,
            grid=(B, grid_hw),
            in_specs=[
                # X: one [C_eff, hw_tile] spatial tile of batch b (batch dim squeezed)
                pl.BlockSpec((None, c_eff, hw_tile), lambda b, k: (b, 0, k)),
                # Weights/biases: constant block index -> DMA'd once, VMEM-resident.
                pl.BlockSpec((hid, C), lambda b, k: (0, 0)),
                pl.BlockSpec((hid, 1), lambda b, k: (0, 0)),
                pl.BlockSpec((out_f, hid), lambda b, k: (0, 0)),
                pl.BlockSpec((out_f, 1), lambda b, k: (0, 0)),
            ],
            out_specs=pl.BlockSpec((None, out_f, 1), lambda b, k: (b, 0, 0)),
            scratch_shapes=[
                pltpu.VMEM((c_eff, _LANES), jnp.float32),   # running lane-wise sum
                pltpu.VMEM((c_eff, _LANES), jnp.float32),   # running lane-wise max
            ],
        ),
        compiler_params=pltpu.CompilerParams(
            dimension_semantics=("parallel", "arbitrary"),
            vmem_limit_bytes=vmem_limit,
        ),
        cost_estimate=cost,
    )(x_view, w1t, b1c, w2t, b2c)

    return y.reshape(B, out_f, 1, 1)


def _reference(x, w1, b1, w2, b2):
    # Pure-JAX reference mirroring the PyTorch forward.
    B = x.shape[0]
    avg = jnp.mean(x, axis=(2, 3))
    mx = jnp.max(x, axis=(2, 3))

    def mlp(v):
        h = jax.nn.relu(v @ w1 + b1)
        return jax.nn.sigmoid(h @ w2 + b2)

    y = jax.nn.sigmoid(mlp(avg) + mlp(mx))
    return y.reshape(B, -1, 1, 1)


if __name__ == "__main__":
    key = jax.random.PRNGKey(0)
    B, C, H, W = 2, 4, 16, 16          # in_features = C = 4
    hidden = 32
    out_features = C

    k_x, k_w1, k_b1, k_w2, k_b2 = jax.random.split(key, 5)
    x = jax.random.normal(k_x, (B, C, H, W), dtype=jnp.float32)

    bnd1 = 1.0 / (C ** 0.5)
    w1 = jax.random.uniform(k_w1, (C, hidden), jnp.float32, -bnd1, bnd1)
    b1 = jax.random.uniform(k_b1, (hidden,), jnp.float32, -bnd1, bnd1)
    bnd2 = 1.0 / (hidden ** 0.5)
    w2 = jax.random.uniform(k_w2, (hidden, out_features), jnp.float32, -bnd2, bnd2)
    b2 = jax.random.uniform(k_b2, (out_features,), jnp.float32, -bnd2, bnd2)

    # 1) Primary check at the spec'd small shape (sublane-folded, single tile).
    y = jax.block_until_ready(spectral_attention(x, w1, b1, w2, b2))
    y_ref = _reference(x, w1, b1, w2, b2)
    assert y.shape == (B, out_features, 1, 1)
    assert jnp.allclose(y, y_ref, atol=1e-5, rtol=1e-5)

    # 2) Single full tile whose width is not a multiple of 128.
    x2 = jax.random.normal(jax.random.PRNGKey(1), (B, C, 24, 24), dtype=jnp.float32)
    y2 = jax.block_until_ready(spectral_attention(x2, w1, b1, w2, b2))
    assert jnp.allclose(y2, _reference(x2, w1, b1, w2, b2), atol=1e-5, rtol=1e-5)

    # 3) Multi-tile streaming path with a masked partial tail tile.
    y3 = jax.block_until_ready(spectral_attention(x2, w1, b1, w2, b2, hw_tile=128))
    assert jnp.allclose(y3, _reference(x2, w1, b1, w2, b2), atol=1e-5, rtol=1e-5)

    # 4) No-fold path (C >= 8), odd batch size.
    C4 = 16
    k2 = jax.random.split(jax.random.PRNGKey(2), 5)
    x4 = jax.random.normal(k2[0], (1, C4, 12, 12), dtype=jnp.float32)
    w1_4 = jax.random.uniform(k2[1], (C4, hidden), jnp.float32, -0.25, 0.25)
    b1_4 = jax.random.uniform(k2[2], (hidden,), jnp.float32, -0.25, 0.25)
    w2_4 = jax.random.uniform(k2[3], (hidden, C4), jnp.float32, -bnd2, bnd2)
    b2_4 = jax.random.uniform(k2[4], (C4,), jnp.float32, -bnd2, bnd2)
    y4 = jax.block_until_ready(spectral_attention(x4, w1_4, b1_4, w2_4, b2_4))
    assert jnp.allclose(y4, _reference(x4, w1_4, b1_4, w2_4, b2_4), atol=1e-5, rtol=1e-5)

    # 5) bf16 activations (halved HBM traffic; f32 accumulation in-kernel).
    xb = x.astype(jnp.bfloat16)
    yb = jax.block_until_ready(spectral_attention(xb, w1, b1, w2, b2))
    yb_ref = _reference(xb.astype(jnp.float32), w1, b1, w2, b2)
    assert jnp.allclose(yb, yb_ref, atol=1e-3, rtol=1e-3)

    print("KERNEL_OK")
</pallas_src>

<mosaic_0001>
module attributes {stable_mosaic.version = 11 : i64} {
  func.func @_spectral_attention_kernel(%arg0: i32, %arg1: i32, %arg2: memref<1x8x128xf32, #tpu.memory_space<vmem>>, %arg3: memref<32x4xf32, #tpu.memory_space<vmem>>, %arg4: memref<32x1xf32, #tpu.memory_space<vmem>>, %arg5: memref<4x32xf32, #tpu.memory_space<vmem>>, %arg6: memref<4x1xf32, #tpu.memory_space<vmem>>, %arg7: memref<1x4x1xf32, #tpu.memory_space<vmem>>, %arg8: memref<8x128xf32, #tpu.memory_space<vmem>>, %arg9: memref<8x128xf32, #tpu.memory_space<vmem>>) attributes {dimension_semantics = [#tpu.dimension_semantics<parallel>, #tpu.dimension_semantics<arbitrary>], iteration_bounds = array<i64: 2, 1>, scalar_prefetch = 0 : i64, scratch_operands = 2 : i64, tpu.core_type = #tpu.core_type<tc>, window_params = [{transform_indices = @transform_0, window_bounds = array<i64: 1, 8, 128>}, {pipeline_mode = #tpu.pipeline_mode<synchronous>, transform_indices = @transform_1, window_bounds = array<i64: 32, 4>}, {pipeline_mode = #tpu.pipeline_mode<synchronous>, transform_indices = @transform_2, window_bounds = array<i64: 32, 1>}, {pipeline_mode = #tpu.pipeline_mode<synchronous>, transform_indices = @transform_3, window_bounds = array<i64: 4, 32>}, {pipeline_mode = #tpu.pipeline_mode<synchronous>, transform_indices = @transform_4, window_bounds = array<i64: 4, 1>}, {transform_indices = @transform_5, window_bounds = array<i64: 1, 4, 1>}]} {
    %c0_i32 = arith.constant 0 : i32
    %0 = arith.cmpi eq, %arg1, %c0_i32 : i32
    %1 = arith.extui %0 : i1 to i32
    %c0_i32_0 = arith.constant 0 : i32
    %2 = arith.cmpi ne, %1, %c0_i32_0 : i32
    scf.if %2 {
      %cst = arith.constant 0.000000e+00 : f32
      %17 = vector.broadcast %cst : f32 to vector<8x128xf32>
      %c0_13 = arith.constant 0 : index
      %c0_14 = arith.constant 0 : index
      %18 = vector.load %arg8[%c0_13, %c0_14] : memref<8x128xf32, #tpu.memory_space<vmem>>, vector<8x128xf32>
      tpu.vector_store %arg8[%c0_13, %c0_14], %17 {strides = array<i32>} : memref<8x128xf32, #tpu.memory_space<vmem>>, vector<8x128xf32>,
      %cst_15 = arith.constant 0xFF800000 : f32
      %19 = vector.broadcast %cst_15 : f32 to vector<8x128xf32>
      %c0_16 = arith.constant 0 : index
      %c0_17 = arith.constant 0 : index
      %20 = vector.load %arg9[%c0_16, %c0_17] : memref<8x128xf32, #tpu.memory_space<vmem>>, vector<8x128xf32>
      tpu.vector_store %arg9[%c0_16, %c0_17], %19 {strides = array<i32>} : memref<8x128xf32, #tpu.memory_space<vmem>>, vector<8x128xf32>,
    } else {
    }
    %c0_i32_1 = arith.constant 0 : i32
    %c128_i32 = arith.constant 128 : i32
    %3 = arith.muli %c0_i32_1, %c128_i32 : i32
    %4 = tpu.assume_multiple %3, 128 : i32
    %c0 = arith.constant 0 : index
    %c0_2 = arith.constant 0 : index
    %5 = arith.index_cast %4 : i32 to index
    %6 = vector.load %arg2[%c0, %c0_2, %5] : memref<1x8x128xf32, #tpu.memory_space<vmem>>, vector<1x8x128xf32>
    %7 = vector.shape_cast %6 : vector<1x8x128xf32> to vector<8x128xf32>
    %c0_3 = arith.constant 0 : index
    %c0_4 = arith.constant 0 : index
    %8 = vector.load %arg8[%c0_3, %c0_4] : memref<8x128xf32, #tpu.memory_space<vmem>>, vector<8x128xf32>
    %9 = arith.addf %8, %7 : vector<8x128xf32>
    %c0_5 = arith.constant 0 : index
    %c0_6 = arith.constant 0 : index
    %10 = vector.load %arg8[%c0_5, %c0_6] : memref<8x128xf32, #tpu.memory_space<vmem>>, vector<8x128xf32>
    tpu.vector_store %arg8[%c0_5, %c0_6], %9 {strides = array<i32>} : memref<8x128xf32, #tpu.memory_space<vmem>>, vector<8x128xf32>,
    %c0_7 = arith.constant 0 : index
    %c0_8 = arith.constant 0 : index
    %11 = vector.load %arg9[%c0_7, %c0_8] : memref<8x128xf32, #tpu.memory_space<vmem>>, vector<8x128xf32>
    %12 = arith.maximumf %11, %7 : vector<8x128xf32>
    %c0_9 = arith.constant 0 : index
    %c0_10 = arith.constant 0 : index
    %13 = vector.load %arg9[%c0_9, %c0_10] : memref<8x128xf32, #tpu.memory_space<vmem>>, vector<8x128xf32>
    tpu.vector_store %arg9[%c0_9, %c0_10], %12 {strides = array<i32>} : memref<8x128xf32, #tpu.memory_space<vmem>>, vector<8x128xf32>,
    %c1_i32 = arith.constant 1 : i32
    %c0_i32_11 = arith.constant 0 : i32
    %14 = arith.cmpi eq, %arg1, %c0_i32_11 : i32
    %15 = arith.extui %14 : i1 to i32
    %c0_i32_12 = arith.constant 0 : i32
    %16 = arith.cmpi ne, %15, %c0_i32_12 : i32
    scf.if %16 {
      %c0_13 = arith.constant 0 : index
      %c0_14 = arith.constant 0 : index
      %17 = vector.load %arg8[%c0_13, %c0_14] : memref<8x128xf32, #tpu.memory_space<vmem>>, vector<8x128xf32>
      %cst = arith.constant dense<0.000000e+00> : vector<8xf32>
      %18 = vector.multi_reduction <add>, %17, %cst [1] : vector<8x128xf32> to vector<8xf32>
      %19 = vector.shape_cast %18 : vector<8xf32> to vector<8x1xf32>
      %c0_15 = arith.constant 0 : index
      %c0_16 = arith.constant 0 : index
      %20 = vector.load %arg9[%c0_15, %c0_16] : memref<8x128xf32, #tpu.memory_space<vmem>>, vector<8x128xf32>
      %cst_17 = arith.constant dense<0xFF800000> : vector<8xf32>
      %21 = vector.multi_reduction <maximumf>, %20, %cst_17 [1] : vector<8x128xf32> to vector<8xf32>
      %22 = vector.shape_cast %21 : vector<8xf32> to vector<8x1xf32>
      %23 = vector.extract_strided_slice %19 {offsets = [0, 0], sizes = [2, 1], strides = [1, 1]} : vector<8x1xf32> to vector<2x1xf32>
      %cst_18 = arith.constant dense<0.000000e+00> : vector<1xf32>
      %24 = vector.multi_reduction <add>, %23, %cst_18 [0] : vector<2x1xf32> to vector<1xf32>
      %25 = vector.shape_cast %24 : vector<1xf32> to vector<1x1xf32>
      %26 = vector.extract_strided_slice %22 {offsets = [0, 0], sizes = [2, 1], strides = [1, 1]} : vector<8x1xf32> to vector<2x1xf32>
      %cst_19 = arith.constant dense<0xFF800000> : vector<1xf32>
      %27 = vector.multi_reduction <maximumf>, %26, %cst_19 [0] : vector<2x1xf32> to vector<1xf32>
      %28 = vector.shape_cast %27 : vector<1xf32> to vector<1x1xf32>
      %29 = vector.extract_strided_slice %19 {offsets = [2, 0], sizes = [2, 1], strides = [1, 1]} : vector<8x1xf32> to vector<2x1xf32>
      %cst_20 = arith.constant dense<0.000000e+00> : vector<1xf32>
      %30 = vector.multi_reduction <add>, %29, %cst_20 [0] : vector<2x1xf32> to vector<1xf32>
      %31 = vector.shape_cast %30 : vector<1xf32> to vector<1x1xf32>
      %32 = vector.extract_strided_slice %22 {offsets = [2, 0], sizes = [2, 1], strides = [1, 1]} : vector<8x1xf32> to vector<2x1xf32>
      %cst_21 = arith.constant dense<0xFF800000> : vector<1xf32>
      %33 = vector.multi_reduction <maximumf>, %32, %cst_21 [0] : vector<2x1xf32> to vector<1xf32>
      %34 = vector.shape_cast %33 : vector<1xf32> to vector<1x1xf32>
      %35 = vector.extract_strided_slice %19 {offsets = [4, 0], sizes = [2, 1], strides = [1, 1]} : vector<8x1xf32> to vector<2x1xf32>
      %cst_22 = arith.constant dense<0.000000e+00> : vector<1xf32>
      %36 = vector.multi_reduction <add>, %35, %cst_22 [0] : vector<2x1xf32> to vector<1xf32>
      %37 = vector.shape_cast %36 : vector<1xf32> to vector<1x1xf32>
      %38 = vector.extract_strided_slice %22 {offsets = [4, 0], sizes = [2, 1], strides = [1, 1]} : vector<8x1xf32> to vector<2x1xf32>
      %cst_23 = arith.constant dense<0xFF800000> : vector<1xf32>
      %39 = vector.multi_reduction <maximumf>, %38, %cst_23 [0] : vector<2x1xf32> to vector<1xf32>
      %40 = vector.shape_cast %39 : vector<1xf32> to vector<1x1xf32>
      %41 = vector.extract_strided_slice %19 {offsets = [6, 0], sizes = [2, 1], strides = [1, 1]} : vector<8x1xf32> to vector<2x1xf32>
      %cst_24 = arith.constant dense<0.000000e+00> : vector<1xf32>
      %42 = vector.multi_reduction <add>, %41, %cst_24 [0] : vector<2x1xf32> to vector<1xf32>
      %43 = vector.shape_cast %42 : vector<1xf32> to vector<1x1xf32>
      %44 = vector.extract_strided_slice %22 {offsets = [6, 0], sizes = [2, 1], strides = [1, 1]} : vector<8x1xf32> to vector<2x1xf32>
      %cst_25 = arith.constant dense<0xFF800000> : vector<1xf32>
      %45 = vector.multi_reduction <maximumf>, %44, %cst_25 [0] : vector<2x1xf32> to vector<1xf32>
      %46 = vector.shape_cast %45 : vector<1xf32> to vector<1x1xf32>
      %47 = tpu.concatenate %25, %31, %37, %43 in 0 : vector<1x1xf32>, vector<1x1xf32>, vector<1x1xf32>, vector<1x1xf32> -> vector<4x1xf32>
      %48 = tpu.concatenate %28, %34, %40, %46 in 0 : vector<1x1xf32>, vector<1x1xf32>, vector<1x1xf32>, vector<1x1xf32> -> vector<4x1xf32>
      %cst_26 = arith.constant 3.906250e-03 : f32
      %49 = vector.broadcast %cst_26 : f32 to vector<4x1xf32>
      %50 = arith.mulf %47, %49 : vector<4x1xf32>
      %51 = tpu.concatenate %50, %48 in 1 : vector<4x1xf32>, vector<4x1xf32> -> vector<4x2xf32>
      %c0_27 = arith.constant 0 : index
      %c0_28 = arith.constant 0 : index
      %52 = vector.load %arg3[%c0_27, %c0_28] : memref<32x4xf32, #tpu.memory_space<vmem>>, vector<32x4xf32>
      %cst_29 = arith.constant dense<0.000000e+00> : vector<32x2xf32>
      %53 = tpu.matmul %52, %51, %cst_29 {dimension_numbers = #tpu.dot_dimension_numbers<[1], [0], [0], [1], [0, 0, 1, 1], [], []>} : vector<32x4xf32>, vector<4x2xf32>, vector<32x2xf32> -> vector<32x2xf32>
      %c0_30 = arith.constant 0 : index
      %c0_31 = arith.constant 0 : index
      %54 = vector.load %arg4[%c0_30, %c0_31] : memref<32x1xf32, #tpu.memory_space<vmem>>, vector<32x1xf32>
      %55 = vector.broadcast %54 : vector<32x1xf32> to vector<32x2xf32>
      %56 = arith.addf %53, %55 : vector<32x2xf32>
      %cst_32 = arith.constant 0.000000e+00 : f32
      %57 = vector.broadcast %cst_32 : f32 to vector<32x2xf32>
      %58 = arith.maximumf %56, %57 : vector<32x2xf32>
      %c0_33 = arith.constant 0 : index
      %c0_34 = arith.constant 0 : index
      %59 = vector.load %arg5[%c0_33, %c0_34] : memref<4x32xf32, #tpu.memory_space<vmem>>, vector<4x32xf32>
      %cst_35 = arith.constant dense<0.000000e+00> : vector<4x2xf32>
      %60 = tpu.matmul %59, %58, %cst_35 {dimension_numbers = #tpu.dot_dimension_numbers<[1], [0], [0], [1], [0, 0, 1, 1], [], []>} : vector<4x32xf32>, vector<32x2xf32>, vector<4x2xf32> -> vector<4x2xf32>
      %c0_36 = arith.constant 0 : index
      %c0_37 = arith.constant 0 : index
      %61 = vector.load %arg6[%c0_36, %c0_37] : memref<4x1xf32, #tpu.memory_space<vmem>>, vector<4x1xf32>
      %62 = vector.broadcast %61 : vector<4x1xf32> to vector<4x2xf32>
      %63 = arith.addf %60, %62 : vector<4x2xf32>
      %64 = arith.negf %63 : vector<4x2xf32>
      %65 = math.exp %64 : vector<4x2xf32>
      %cst_38 = arith.constant 1.000000e+00 : f32
      %66 = vector.broadcast %cst_38 : f32 to vector<4x2xf32>
      %67 = arith.addf %66, %65 : vector<4x2xf32>
      %68 = arith.divf %66, %67 : vector<4x2xf32>
      %69 = vector.extract_strided_slice %68 {offsets = [0, 0], sizes = [4, 1], strides = [1, 1]} : vector<4x2xf32> to vector<4x1xf32>
      %70 = vector.extract_strided_slice %68 {offsets = [0, 1], sizes = [4, 1], strides = [1, 1]} : vector<4x2xf32> to vector<4x1xf32>
      %71 = arith.addf %69, %70 : vector<4x1xf32>
      %72 = arith.negf %71 : vector<4x1xf32>
      %73 = math.exp %72 : vector<4x1xf32>
      %cst_39 = arith.constant 1.000000e+00 : f32
      %74 = vector.broadcast %cst_39 : f32 to vector<4x1xf32>
      %75 = arith.addf %74, %73 : vector<4x1xf32>
      %76 = arith.divf %74, %75 : vector<4x1xf32>
      %c0_40 = arith.constant 0 : index
      %c0_41 = arith.constant 0 : index
      %c0_42 = arith.constant 0 : index
      %77 = vector.load %arg7[%c0_40, %c0_41, %c0_42] : memref<1x4x1xf32, #tpu.memory_space<vmem>>, vector<1x4x1xf32>
      %78 = vector.shape_cast %77 : vector<1x4x1xf32> to vector<4x1xf32>
      %79 = vector.shape_cast %76 : vector<4x1xf32> to vector<1x4x1xf32>
      tpu.vector_store %arg7[%c0_40, %c0_41, %c0_42], %79 {strides = array<i32>} : memref<1x4x1xf32, #tpu.memory_space<vmem>>, vector<1x4x1xf32>,
    } else {
    }
    return
  }
  func.func @transform_0(%arg0: i32, %arg1: i32) -> (i32, i32, i32) {
    %c0_i32 = arith.constant 0 : i32
    %c0_i32_0 = arith.constant 0 : i32
    return %arg0, %c0_i32, %arg1 : i32, i32, i32
  }
  func.func @transform_1(%arg0: i32, %arg1: i32) -> (i32, i32) {
    %c0_i32 = arith.constant 0 : i32
    %c0_i32_0 = arith.constant 0 : i32
    %c0_i32_1 = arith.constant 0 : i32
    return %c0_i32, %c0_i32_0 : i32, i32
  }
  func.func @transform_2(%arg0: i32, %arg1: i32) -> (i32, i32) {
    %c0_i32 = arith.constant 0 : i32
    %c0_i32_0 = arith.constant 0 : i32
    %c0_i32_1 = arith.constant 0 : i32
    return %c0_i32, %c0_i32_0 : i32, i32
  }
  func.func @transform_3(%arg0: i32, %arg1: i32) -> (i32, i32) {
    %c0_i32 = arith.constant 0 : i32
    %c0_i32_0 = arith.constant 0 : i32
    %c0_i32_1 = arith.constant 0 : i32
    return %c0_i32, %c0_i32_0 : i32, i32
  }
  func.func @transform_4(%arg0: i32, %arg1: i32) -> (i32, i32) {
    %c0_i32 = arith.constant 0 : i32
    %c0_i32_0 = arith.constant 0 : i32
    %c0_i32_1 = arith.constant 0 : i32
    return %c0_i32, %c0_i32_0 : i32, i32
  }
  func.func @transform_5(%arg0: i32, %arg1: i32) -> (i32, i32, i32) {
    %c0_i32 = arith.constant 0 : i32
    %c0_i32_0 = arith.constant 0 : i32
    %c0_i32_1 = arith.constant 0 : i32
    return %arg0, %c0_i32, %c0_i32_0 : i32, i32, i32
  }
}

</mosaic_0001>

<bundles_post_ra>
// kernel: tpu_custom_call.1
= control target key start
LH: loop header
LB: loop body
LE: loop exit
PB: predicated region body
PF: predicated region fallthrough
CT: control target
= control target key end

     0   :  { %s789_s18 = smov 0   ;;  %s791_s19 = smov 0   ;;  %s871_s0 = inlined_call_operand.vmem [shape: f32[2,8,128], index: 0, kind: input, shape index: {}]   ;;  %s872_s1 = inlined_call_operand.vmem [shape: f32[32,4], index: 1, kind: input, shape index: {}]   ;;  %s873_s2 = inlined_call_operand.vmem [shape: f32[32,1], index: 2, kind: input, shape index: {}]   ;;  %s874_s3 = inlined_call_operand.vmem [shape: f32[4,32], index: 3, kind: input, shape index: {}]   ;;  %s875_s4 = inlined_call_operand.vmem [shape: f32[4,1], index: 4, kind: input, shape index: {}]   ;;  %s876_s5 = inlined_call_operand.vmem [shape: f32[2,4,1], index: 5, kind: output, shape index: {}]  }
   0x1   :  { %s793_s20 = smov 0  }
   0x2 LB: > { %s27_s21 = sadd.s32 1, %s748_s19  ;;  %p649_p0 = scmp.ge.s32.totalorder %s752_s20, 1  ;;  %s752_s20 = sphi %s793_s20, %s15_s20   ;;  %s748_s19 = sphi %s791_s19, %s878_s19   ;;  %s744_s18 = sphi %s789_s18, %s877_s18  }
   0x3   : > { %p29_p1 = scmp.ge.s32.totalorder %s27_s21, 2  ;;  %p203_p2 = scmp.lt.s32.totalorder %s752_s20, 3 }
   0x5   : > { %s880_s21 = smov (%p29_p1, %s27_s21), 0  ;;  %p204_p3 = pnand %p649_p0, %p203_p2 }
   0x6   : > { %p232_p4 = scmp.lt.s32.totalorder (!%p204_p3), %s744_s18, 1  ;;  %s755_s30 = smov (!%p204_p3), 1  }
   0x7   : > { %207 = sbr.rel (%p204_p3) target bundleno = 873 (0x369), region = 40  ;;  %s758_s26 = smov (!%p204_p3), 127  }
   0xc   : > { %s882_s18 = smov (!%p232_p4, %s744_s18), 1  ;;  %vm265_vm0 = vcmask 1041408   ;;  %vm290_vm1 = vcmask 1043458   ;;  %vm307_vm2 = vcmask 1045508   ;;  %vm324_vm3 = vcmask 1047558   ;;  %v347_v46 = vld [vmem:[%s872_s1] sm:$0xff] }
   0xd   : > { %s650_s22 = sshll.u32 %s882_s18, 3  ;;  %vm332_vm4 = vcmask 1040384   ;;  %vm335_vm5 = vcmask 1042432   ;;  %vm375_vm6 = vcmask 31744   ;;  %v353_v53 = vld [vmem:[%s873_s2 + $0x10] sm:$0xff]  ;;  %v754_v58 = vmov 0  }
   0xe   : > { %s238_s25 = scalar_lea.vmem %s871_s0, %s650_s22  ;;  %674 = vmatprep.mubr.msk.f32.mxu0 %vm375_vm6, %v347_v46  ;;  %720 = vset.pattern.permute.xlu1 %v754_v58  ;;  %vm345_vm7 = vcmask 7168   ;;  %vm388_vm8 = vcmask 1043456   ;;  %vm757_vm9 = vmmov 0   ;;  %vm488_vm10 = vcmask 261120   ;;  %s651_s27 = sshll.u32 %s882_s18, 2 }
   0xf   : > { %v249_v0 = vld [vmem:[%s238_s25] sm:$0xff]  ;;  %721 = vset.pattern.permute.xlu0 %v754_v58  ;;  %vm579_vm11 = vcmask 3072  }
  0x10   : > { %263 = vmax.xlane.f32.xlu0 %v249_v0 }
  0x14   : > { %260 = vadd.xlane.f32.xlu0 %v249_v0 }
  0x2a   : > { %367 = vperm.xlu0 %721, %v353_v53  }
  0x99   : > { %v264_v1 = vpop.xlane.xlu0 %263 }
  0x9a   : > { %v273_v2 = vsel %vm265_vm0, %v264_v1, -inf  ;;  %v291_v3 = vsel %vm290_vm1, %v264_v1, -inf  ;;  %v308_v4 = vsel %vm307_vm2, %v264_v1, -inf  ;;  %v325_v5 = vsel %vm324_vm3, %v264_v1, -inf  ;;  %v354_v1 = vld [vmem:[%s873_s2 + $0x18] sm:$0xff] }
  0x9b   : > { %v274_v6 = vrot.slane %v273_v2, 4  ;;  %v292_v7 = vrot.slane %v291_v3, 4  ;;  %v309_v8 = vrot.slane %v308_v4, 4  ;;  %v326_v9 = vrot.slane %v325_v5, 4 }
  0x9d   : > { %v275_v10 = vmax.f32 %v273_v2, %v274_v6  ;;  %v293_v11 = vmax.f32 %v291_v3, %v292_v7  ;;  %v310_v12 = vmax.f32 %v308_v4, %v309_v8  ;;  %v327_v13 = vmax.f32 %v325_v5, %v326_v9  ;;  %v261_v14 = vpop.xlane.xlu0 %260  ;;  %v352_v7 = vld [vmem:[%s873_s2 + $0x8] sm:$0xff]  ;;  %v351_v9 = vld [vmem:[%s873_s2] sm:$0xff] }
  0x9e   : > { %v266_v15 = vsel %vm265_vm0, %v261_v14, 0.0  ;;  %v281_v16 = vrot.slane %v261_v14, 2  ;;  %v298_v17 = vrot.slane %v261_v14, 4  ;;  %v315_v18 = vrot.slane %v261_v14, 6  ;;  %v348_v14 = vld [vmem:[%s872_s1 + $0x8] sm:$0xff] }
  0x9f   : > { %v276_v19 = vrot.slane %v275_v10, 2  ;;  %v294_v20 = vrot.slane %v293_v11, 2  ;;  %v311_v21 = vrot.slane %v310_v12, 2  ;;  %v328_v22 = vrot.slane %v327_v13, 2 }
  0xa0   : > { %v267_v23 = vrot.slane %v266_v15, 4  ;;  %v283_v24 = vsel %vm265_vm0, %v281_v16, 0.0  ;;  %v300_v25 = vsel %vm265_vm0, %v298_v17, 0.0  ;;  %v317_v26 = vsel %vm265_vm0, %v315_v18, 0.0  ;;  %v350_v16 = vld [vmem:[%s872_s1 + $0x18] sm:$0xff] }
  0xa1   : > { %v277_v27 = vmax.f32 %v275_v10, %v276_v19  ;;  %v295_v28 = vmax.f32 %v293_v11, %v294_v20  ;;  %v312_v29 = vmax.f32 %v310_v12, %v311_v21  ;;  %v329_v30 = vmax.f32 %v327_v13, %v328_v22  ;;  %v482_v10 = vld [vmem:[%s875_s4] sm:$0xf] }
  0xa2   : > { %v268_v31 = vadd.f32 %v267_v23, %v266_v15  ;;  %v284_v32 = vrot.slane %v283_v24, 4  ;;  %v301_v33 = vrot.slane %v300_v25, 4  ;;  %v318_v34 = vrot.slane %v317_v26, 4  ;;  %v349_v15 = vld [vmem:[%s872_s1 + $0x10] sm:$0xff] }
  0xa3   : > { %v278_v35 = vrot.slane %v277_v27, 1  ;;  %v296_v36 = vrot.slane %v295_v28, 1  ;;  %v313_v37 = vrot.slane %v312_v29, 1  ;;  %v330_v38 = vrot.slane %v329_v30, 1 }
  0xa4   : > { %v269_v39 = vrot.slane %v268_v31, 2  ;;  %v285_v40 = vadd.f32 %v284_v32, %v283_v24  ;;  %v302_v41 = vadd.f32 %v301_v33, %v300_v25  ;;  %v319_v42 = vadd.f32 %v318_v34, %v317_v26  ;;  %v481_v34 = vld [vmem:[%s874_s3] sm:$0xf] }
  0xa5   : > { %v279_v43 = vmax.f32 %v277_v27, %v278_v35  ;;  %v297_v44 = vmax.f32 %v295_v28, %v296_v36  ;;  %v314_v45 = vmax.f32 %v312_v29, %v313_v37  ;;  %v331_v51 = vmax.f32 %v329_v30, %v330_v38  ;;  %v368_v23 = vpop.permute.xlu0 %367 }
  0xa6   : > { %v270_v47 = vadd.f32 %v269_v39, %v268_v31  ;;  %v286_v48 = vrot.slane %v285_v40, 2  ;;  %v303_v49 = vrot.slane %v302_v41, 2  ;;  %v320_v50 = vrot.slane %v319_v42, 2 }
  0xa7   : > { %v337_v52 = vsel %vm332_vm4, %v279_v43, %v297_v44  ;;  %v756_v17 = vmov 0.0  }
  0xa8   : > { %v338_v54 = vsel %vm265_vm0, %v337_v52, %v314_v45  ;;  %v271_v55 = vrot.slane %v270_v47, 1  ;;  %v287_v56 = vadd.f32 %v286_v48, %v285_v40  ;;  %v304_v57 = vadd.f32 %v303_v49, %v302_v41  ;;  %680 = vmatprep.subr.mxu1 %v756_v17  ;;  %688 = vmatprep.mubr.msk.f32.mxu1 %vm757_vm9, %v756_v17 }
  0xa9   : > { %v339_v59 = vsel %vm335_vm5, %v338_v54, %v331_v51  ;;  %v321_v60 = vadd.f32 %v320_v50, %v319_v42 }
  0xaa   : > { %342 = vrot.lane.b32.xlu1 %v339_v59, %s755_s30  ;;  %v272_v61 = vadd.f32 %v271_v55, %v270_v47  ;;  %v288_v62 = vrot.slane %v287_v56, 1  ;;  %v305_v63 = vrot.slane %v304_v57, 1  ;;  %s242_s30 = scalar_lea.vmem %s876_s5, %s651_s27 }
  0xab   : > { %v322_v0 = vrot.slane %v321_v60, 1 }
  0xac   : > { %v289_v2 = vadd.f32 %v288_v62, %v287_v56  ;;  %v306_v3 = vadd.f32 %v305_v63, %v304_v57 }
  0xad   : > { %v323_v4 = vadd.f32 %v322_v0, %v321_v60 }
  0xae   : > { %v333_v5 = vsel %vm332_vm4, %v272_v61, %v289_v2  ;;  %372 = vperm.xlu1 %720, %v354_v1  }
  0xaf   : > { %v334_v6 = vsel %vm265_vm0, %v333_v5, %v306_v3 }
  0xb0   : > { %v336_v8 = vsel %vm335_vm5, %v334_v6, %v323_v4 }
  0xb1   : > { %v340_v11 = vmul.f32 0.00390625, %v336_v8 }
  0xb2   : > { %362 = vperm.xlu1 %720, %v352_v7  }
  0xb6   : > { %357 = vperm.xlu1 %720, %v351_v9  }
  0xba   : > { %485 = vperm.xlu1 %720, %v482_v10  }
 0x11c   : > { %v343_v12 = vpop.permute.xlu1 %342 }
 0x11d   : > { %v346_v13 = vsel %vm345_vm7, %v340_v11, %v343_v12 }
 0x11e   : > { %672 = vmatprep.subr.msk.mxu0 %vm388_vm8, %v346_v13 }
 0x11f   : > { %673 = vmatpush3.msk.msra.mxu0 %vm388_vm8, %v346_v13 }
 0x120   : > { %675 = vmatmul.mubr.msk.f32.vlgmr.msra.gmra.mxu0 %vm375_vm6, %v348_v14 }
 0x121   : > { %677 = vmatprep.mubr.msk.f32.mxu0 %vm375_vm6, %v349_v15 }
 0x124   : > { %678 = vmatmul.mubr.msk.f32.gmra.mxu0 %vm375_vm6, %v350_v16 }
 0x129   : > { %v373_v18 = vpop.permute.xlu1 %372 }
 0x12d   : > { %v363_v20 = vpop.permute.xlu1 %362 }
 0x131   : > { %v358_v29 = vpop.permute.xlu1 %357 }
 0x135   : > { %v486_v35 = vpop.permute.xlu1 %485 }
 0x1e0   : > { %v676_v19 = vpop.f32.mrf.mxu0 }
 0x1e1   : > { %v464_v26 = vadd.f32 %v676_v19, %v363_v20 }
 0x1e2   : > { %v458_v21 = vpop.f32.mrf.mxu0 }
 0x1e3   : > { %v459_v30 = vadd.f32 %v458_v21, %v358_v29  ;;  %v478_v32 = vmax.f32 %v464_v26, 0.0 }
 0x1e4   : > { %v679_v22 = vpop.f32.mrf.mxu0 }
 0x1e5   : > { %v474_v24 = vadd.f32 %v679_v22, %v373_v18  ;;  %v477_v33 = vmax.f32 %v459_v30, 0.0 }
 0x1e6   : > { %v468_v25 = vpop.f32.mrf.mxu0 }
 0x1e7   : > { %v480_v27 = vmax.f32 %v474_v24, 0.0  ;;  %v469_v28 = vadd.f32 %v468_v25, %v368_v23 }
 0x1e9   : > { %v479_v31 = vmax.f32 %v469_v28, 0.0  ;;  %681 = vmatpush3.msra.mxu1 %v480_v27 }
 0x1ea   : > { %682 = vmatprep.subr.mxu1 %v756_v17 }
 0x1eb   : > { %683 = vmatpush3.msra.mxu1 %v479_v31 }
 0x1ec   : > { %684 = vmatprep.subr.mxu1 %v756_v17 }
 0x1ed   : > { %685 = vmatpush3.msra.mxu1 %v478_v32 }
 0x1ee   : > { %686 = vmatprep.subr.mxu1 %v756_v17 }
 0x1ef   : > { %687 = vmatpush3.msra.mxu1 %v477_v33 }
 0x1f0   : > { %689 = vmatmul.mubr.msk.f32.vlgmr.msra.gmra.mxu1 %vm488_vm10, %v481_v34 }
 0x2b0   : > { %v558_v36 = vpop.f32.mrf.mxu1 }
 0x2b1   : > { %v559_v37 = vadd.f32 %v558_v36, %v486_v35 }
 0x2b2   : > { %v690_v38 = vpop.f32.mrf.mxu1 }
 0x2b3   : > { %v658_v39 = vmul.f32 -1.442695, %v559_v37 }
 0x2b5   : > { %722 = vpow2.f32 %v658_v39 }
 0x2c2   : > { %v723_v40 = vpop.eup %722 }
 0x2c3   : > { %v565_v41 = vadd.f32 1.0, %v723_v40 }
 0x2c5   : > { %724 = vrcp.f32 %v565_v41 }
 0x2d2   : > { %v725_v42 = vpop.eup %724 }
 0x2d3   : > { %569 = vrot.lane.b32.xlu1 %v725_v42, %s758_s26 }
 0x345   : > { %v570_v43 = vpop.permute.xlu1 %569 }
 0x346   : > { %v572_v44 = vadd.f32 %v725_v42, %v570_v43 }
 0x348   : > { %v659_v45 = vmul.f32 -1.442695, %v572_v44 }
 0x34a   : > { %726 = vpow2.f32 %v659_v45 }
 0x357   : > { %v727_v46 = vpop.eup %726 }
 0x358   : > { %v576_v47 = vadd.f32 1.0, %v727_v46 }
 0x35a   : > { %728 = vrcp.f32 %v576_v47 }
 0x367   : > { %v729_v48 = vpop.eup %728 }
 0x368   : > { %580 = vst.msk [vmem:[%s242_s30] sm:$0xf] %vm579_vm11, %v729_v48 }
 0x369 PF: > { %s15_s20 = sadd.s32 1, %s752_s20   ;;  %s877_s18 = smov %s748_s19 }
 0x36a   : > { %p12_p5 = scmp.ge.s32.totalorder %s15_s20, 4   ;;  %s878_s19 = smov %s880_s21 }
 0x36c   :  { %14 = sbr.rel (!%p12_p5) target bundleno = 2 (0x2), region = 78 }

</bundles_post_ra>
